<compile_context>
chip_gen: v6e
topology: v6e:2x2x1
jax: 0.10.0
libtpu: 0.0.40
codegen_flags: <defaults>
</compile_context>

<pallas_src>
import functools

import jax
import jax.numpy as jnp
from jax import lax
from jax.experimental import pallas as pl
from jax.experimental.pallas import tpu as pltpu


def _round_up(n, m):
    return ((n + m - 1) // m) * m


def mlp_kernel(x_ref, w1_ref, b1_ref, w2_ref, b2_ref, w3_ref, b3_ref, o_ref):
    """One batch tile of the fused MLP, batch-major.

    x_ref:  [TILE_B, D]
    w1_ref: [16, D]   b1_ref: [1, 16]
    w2_ref: [8, 16]   b2_ref: [1, 8]
    w3_ref: [1, 8]    b3_ref: [1, 1]
    o_ref:  [1, TILE_B]   (lane-dense output slab)
    """
    x = x_ref[...]  # [TILE_B, D]

    # Layer 1: x @ W1^T -> [TILE_B, 16].  Dropout(p=0.05) is identity in eval.
    h1 = lax.dot_general(
        x, w1_ref[...], (((1,), (1,)), ((), ())),
        preferred_element_type=jnp.float32,
    ) + b1_ref[...]
    h1 = jnp.maximum(h1, 0.1 * h1)  # LeakyReLU(negative_slope=0.1)

    # Layer 2: h1 @ W2^T -> [TILE_B, 8]
    h2 = lax.dot_general(
        h1, w2_ref[...], (((1,), (1,)), ((), ())),
        preferred_element_type=jnp.float32,
    ) + b2_ref[...]
    h2 = jnp.maximum(h2, 0.1 * h2)  # LeakyReLU(negative_slope=0.1)

    # Layer 3: W3 @ h2^T -> [1, TILE_B].  Only the small [TILE_B,8] h2 gets
    # relaid out; the output stays lane-dense for unmasked stores.
    h3 = lax.dot_general(
        w3_ref[...], h2, (((1,), (1,)), ((), ())),
        preferred_element_type=jnp.float32,
    ) + b3_ref[...]

    o_ref[...] = h3.astype(o_ref.dtype)


@functools.partial(jax.jit, static_argnames=("tile_b",))
def my_model_forward(x, params, *, tile_b=8192):
    """Runs the fused MLP kernel. x: [B, D] float32 -> [B] float32.

    tile_b ~ 8192 is a good default for v5e/v6e; ~16384 can help on v7x.
    """
    w1, b1, w2, b2, w3, b3 = params
    B, D = x.shape

    # ---- batch tile selection (no jnp.pad copy of x) -----------------------
    if B % 128 == 0:
        tile = min(tile_b, B)
    elif B < 128 and B % 8 == 0:
        # Single exact block: both BlockSpecs use full-dim equality.
        tile = B
    else:
        # Lane/sublane-aligned tile; ragged last block is masked by Pallas.
        tile = min(tile_b, _round_up(B, 128))

    # Keep >= ~8 grid steps on large inputs so v7x's two TensorCores both get
    # work and the DMA pipeline has depth (harmless on v5e/v6e).
    if B >= 8 * 1024:
        tile = min(tile, max(1024, _round_up(pl.cdiv(B, 8), 128)))

    n_steps = pl.cdiv(B, tile)
    grid = (n_steps,)

    # ---- cost estimate (streamed bytes: x in once + output write) ----------
    flops = 2 * B * (D * 16 + 16 * 8 + 8 * 1) + B * (16 + 8 + 1)
    bytes_accessed = (
        n_steps * tile * D * 4          # x streamed in
        + n_steps * tile * 4            # output written back
        + (16 * D + 16 + 8 * 16 + 8 + 8 + 1) * 4   # weights/biases once
    )

    # ---- VMEM budget: x blocks are lane-padded 32 -> 128 lanes --------------
    # x double buffer: 2 * tile * 128 * 4 B; intermediates h1/h2 ~ tile*128*4 B
    # each; plus weights/output (tiny).  Give generous headroom, but stay under
    # v7x's 64 MiB physical VMEM.
    vmem_limit = min(48 * 1024 * 1024,
                     max(16 * 1024 * 1024, 6 * tile * 128 * 4))

    out = pl.pallas_call(
        mlp_kernel,
        out_shape=jax.ShapeDtypeStruct((1, B), jnp.float32),
        grid=grid,
        in_specs=[
            # x: streamed per batch tile (double-buffered by the pipeline).
            pl.BlockSpec((tile, D), lambda i: (i, 0)),
            # Weights/biases: constant block index -> DMA'd once, stay resident.
            pl.BlockSpec((16, D), lambda i: (0, 0)),
            pl.BlockSpec((1, 16), lambda i: (0, 0)),
            pl.BlockSpec((8, 16), lambda i: (0, 0)),
            pl.BlockSpec((1, 8), lambda i: (0, 0)),
            pl.BlockSpec((1, 8), lambda i: (0, 0)),
            pl.BlockSpec((1, 1), lambda i: (0, 0)),
        ],
        # Lane-dense output slab.
        out_specs=pl.BlockSpec((1, tile), lambda i: (0, i)),
        compiler_params=pltpu.CompilerParams(
            dimension_semantics=("parallel",),
            vmem_limit_bytes=vmem_limit,
        ),
        cost_estimate=pl.CostEstimate(
            flops=flops, transcendentals=0, bytes_accessed=bytes_accessed
        ),
    )(x, w1, b1, w2, b2, w3, b3)

    # out is [1, B]; drop the singleton feature dim (x.squeeze(1) in PyTorch).
    return out[0]


def init_params(key, input_dim):
    """Deterministic init mimicking nn.Linear's U(-1/sqrt(fan_in), +1/sqrt(fan_in)).

    Weights in PyTorch [out_features, in_features] layout; biases as
    [1, out_features] so they broadcast along the batch (sublane) axis in-kernel.
    """
    def linear(key, fan_in, fan_out):
        kw, kb = jax.random.split(key)
        bound = 1.0 / jnp.sqrt(fan_in)
        w = jax.random.uniform(kw, (fan_out, fan_in), jnp.float32, -bound, bound)
        b = jax.random.uniform(kb, (1, fan_out), jnp.float32, -bound, bound)
        return w, b

    k1, k2, k3 = jax.random.split(key, 3)
    w1, b1 = linear(k1, input_dim, 16)
    w2, b2 = linear(k2, 16, 8)
    w3, b3 = linear(k3, 8, 1)
    return w1, b1, w2, b2, w3, b3


def reference_forward(x, params):
    """Pure-JAX reference (eval-mode: Dropout is identity)."""
    w1, b1, w2, b2, w3, b3 = params
    leaky = lambda v: jnp.where(v > 0, v, 0.1 * v)
    h = leaky(x @ w1.T + b1)
    h = leaky(h @ w2.T + b2)
    h = h @ w3.T + b3
    return h[:, 0]


if __name__ == "__main__":
    # TODO(synk): Dropout(p=0.05) is treated as identity (inference mode); no
    # RNG masking is implemented for training-mode parity.
    key = jax.random.PRNGKey(0)
    k_x, k_p = jax.random.split(key)

    batch, input_dim = 8, 32
    x = jax.random.normal(k_x, (batch, input_dim), jnp.float32)
    params = init_params(k_p, input_dim)

    out = my_model_forward(x, params)
    out = jax.block_until_ready(out)

    ref = reference_forward(x, params)
    assert out.shape == (batch,), out.shape
    assert jnp.allclose(out, ref, atol=1e-5, rtol=1e-5), (out, ref)

    print("KERNEL_OK")
</pallas_src>

<mosaic_0001>
module attributes {stable_mosaic.version = 11 : i64} {
  func.func @mlp_kernel(%arg0: i32, %arg1: memref<8x32xf32, #tpu.memory_space<vmem>>, %arg2: memref<16x32xf32, #tpu.memory_space<vmem>>, %arg3: memref<1x16xf32, #tpu.memory_space<vmem>>, %arg4: memref<8x16xf32, #tpu.memory_space<vmem>>, %arg5: memref<1x8xf32, #tpu.memory_space<vmem>>, %arg6: memref<1x8xf32, #tpu.memory_space<vmem>>, %arg7: memref<1x1xf32, #tpu.memory_space<vmem>>, %arg8: memref<1x8xf32, #tpu.memory_space<vmem>>) attributes {dimension_semantics = [#tpu.dimension_semantics<parallel>], iteration_bounds = array<i64: 1>, scalar_prefetch = 0 : i64, scratch_operands = 0 : i64, tpu.core_type = #tpu.core_type<tc>, window_params = [{transform_indices = @transform_0, window_bounds = array<i64: 8, 32>}, {pipeline_mode = #tpu.pipeline_mode<synchronous>, transform_indices = @transform_1, window_bounds = array<i64: 16, 32>}, {pipeline_mode = #tpu.pipeline_mode<synchronous>, transform_indices = @transform_2, window_bounds = array<i64: 1, 16>}, {pipeline_mode = #tpu.pipeline_mode<synchronous>, transform_indices = @transform_3, window_bounds = array<i64: 8, 16>}, {pipeline_mode = #tpu.pipeline_mode<synchronous>, transform_indices = @transform_4, window_bounds = array<i64: 1, 8>}, {pipeline_mode = #tpu.pipeline_mode<synchronous>, transform_indices = @transform_5, window_bounds = array<i64: 1, 8>}, {pipeline_mode = #tpu.pipeline_mode<synchronous>, transform_indices = @transform_6, window_bounds = array<i64: 1, 1>}, {transform_indices = @transform_7, window_bounds = array<i64: 1, 8>}]} {
    %c0 = arith.constant 0 : index
    %c0_0 = arith.constant 0 : index
    %0 = vector.load %arg1[%c0, %c0_0] : memref<8x32xf32, #tpu.memory_space<vmem>>, vector<8x32xf32>
    %c0_1 = arith.constant 0 : index
    %c0_2 = arith.constant 0 : index
    %1 = vector.load %arg2[%c0_1, %c0_2] : memref<16x32xf32, #tpu.memory_space<vmem>>, vector<16x32xf32>
    %cst = arith.constant dense<0.000000e+00> : vector<8x16xf32>
    %2 = tpu.matmul %0, %1, %cst {dimension_numbers = #tpu.dot_dimension_numbers<[1], [1], [0], [0], [0, 0, 1, 0], [], []>} : vector<8x32xf32>, vector<16x32xf32>, vector<8x16xf32> -> vector<8x16xf32>
    %c0_3 = arith.constant 0 : index
    %c0_4 = arith.constant 0 : index
    %3 = vector.load %arg3[%c0_3, %c0_4] : memref<1x16xf32, #tpu.memory_space<vmem>>, vector<1x16xf32>
    %4 = vector.broadcast %3 : vector<1x16xf32> to vector<8x16xf32>
    %5 = arith.addf %2, %4 : vector<8x16xf32>
    %cst_5 = arith.constant 1.000000e-01 : f32
    %6 = vector.broadcast %cst_5 : f32 to vector<8x16xf32>
    %7 = arith.mulf %6, %5 : vector<8x16xf32>
    %8 = arith.maximumf %5, %7 : vector<8x16xf32>
    %c0_6 = arith.constant 0 : index
    %c0_7 = arith.constant 0 : index
    %9 = vector.load %arg4[%c0_6, %c0_7] : memref<8x16xf32, #tpu.memory_space<vmem>>, vector<8x16xf32>
    %cst_8 = arith.constant dense<0.000000e+00> : vector<8x8xf32>
    %10 = tpu.matmul %8, %9, %cst_8 {dimension_numbers = #tpu.dot_dimension_numbers<[1], [1], [0], [0], [0, 0, 1, 0], [], []>} : vector<8x16xf32>, vector<8x16xf32>, vector<8x8xf32> -> vector<8x8xf32>
    %c0_9 = arith.constant 0 : index
    %c0_10 = arith.constant 0 : index
    %11 = vector.load %arg5[%c0_9, %c0_10] : memref<1x8xf32, #tpu.memory_space<vmem>>, vector<1x8xf32>
    %12 = vector.broadcast %11 : vector<1x8xf32> to vector<8x8xf32>
    %13 = arith.addf %10, %12 : vector<8x8xf32>
    %cst_11 = arith.constant 1.000000e-01 : f32
    %14 = vector.broadcast %cst_11 : f32 to vector<8x8xf32>
    %15 = arith.mulf %14, %13 : vector<8x8xf32>
    %16 = arith.maximumf %13, %15 : vector<8x8xf32>
    %c0_12 = arith.constant 0 : index
    %c0_13 = arith.constant 0 : index
    %17 = vector.load %arg6[%c0_12, %c0_13] : memref<1x8xf32, #tpu.memory_space<vmem>>, vector<1x8xf32>
    %cst_14 = arith.constant dense<0.000000e+00> : vector<1x8xf32>
    %18 = tpu.matmul %17, %16, %cst_14 {dimension_numbers = #tpu.dot_dimension_numbers<[1], [1], [0], [0], [0, 0, 1, 0], [], []>} : vector<1x8xf32>, vector<8x8xf32>, vector<1x8xf32> -> vector<1x8xf32>
    %c0_15 = arith.constant 0 : index
    %c0_16 = arith.constant 0 : index
    %19 = vector.load %arg7[%c0_15, %c0_16] : memref<1x1xf32, #tpu.memory_space<vmem>>, vector<1x1xf32>
    %20 = vector.broadcast %19 : vector<1x1xf32> to vector<1x8xf32>
    %21 = arith.addf %18, %20 : vector<1x8xf32>
    %c0_17 = arith.constant 0 : index
    %c0_18 = arith.constant 0 : index
    %22 = vector.load %arg8[%c0_17, %c0_18] : memref<1x8xf32, #tpu.memory_space<vmem>>, vector<1x8xf32>
    tpu.vector_store %arg8[%c0_17, %c0_18], %21 {strides = array<i32>} : memref<1x8xf32, #tpu.memory_space<vmem>>, vector<1x8xf32>,
    return
  }
  func.func @transform_0(%arg0: i32) -> (i32, i32) {
    %c0_i32 = arith.constant 0 : i32
    %c0_i32_0 = arith.constant 0 : i32
    return %arg0, %c0_i32 : i32, i32
  }
  func.func @transform_1(%arg0: i32) -> (i32, i32) {
    %c0_i32 = arith.constant 0 : i32
    %c0_i32_0 = arith.constant 0 : i32
    %c0_i32_1 = arith.constant 0 : i32
    return %c0_i32, %c0_i32_0 : i32, i32
  }
  func.func @transform_2(%arg0: i32) -> (i32, i32) {
    %c0_i32 = arith.constant 0 : i32
    %c0_i32_0 = arith.constant 0 : i32
    %c0_i32_1 = arith.constant 0 : i32
    return %c0_i32, %c0_i32_0 : i32, i32
  }
  func.func @transform_3(%arg0: i32) -> (i32, i32) {
    %c0_i32 = arith.constant 0 : i32
    %c0_i32_0 = arith.constant 0 : i32
    %c0_i32_1 = arith.constant 0 : i32
    return %c0_i32, %c0_i32_0 : i32, i32
  }
  func.func @transform_4(%arg0: i32) -> (i32, i32) {
    %c0_i32 = arith.constant 0 : i32
    %c0_i32_0 = arith.constant 0 : i32
    %c0_i32_1 = arith.constant 0 : i32
    return %c0_i32, %c0_i32_0 : i32, i32
  }
  func.func @transform_5(%arg0: i32) -> (i32, i32) {
    %c0_i32 = arith.constant 0 : i32
    %c0_i32_0 = arith.constant 0 : i32
    %c0_i32_1 = arith.constant 0 : i32
    return %c0_i32, %c0_i32_0 : i32, i32
  }
  func.func @transform_6(%arg0: i32) -> (i32, i32) {
    %c0_i32 = arith.constant 0 : i32
    %c0_i32_0 = arith.constant 0 : i32
    %c0_i32_1 = arith.constant 0 : i32
    return %c0_i32, %c0_i32_0 : i32, i32
  }
  func.func @transform_7(%arg0: i32) -> (i32, i32) {
    %c0_i32 = arith.constant 0 : i32
    %c0_i32_0 = arith.constant 0 : i32
    return %c0_i32, %arg0 : i32, i32
  }
}

</mosaic_0001>

<bundles_post_ra>
// kernel: my_model_forward.1
= control target key start
LH: loop header
LB: loop body
LE: loop exit
PB: predicated region body
PF: predicated region fallthrough
CT: control target
= control target key end

     0   :  { %s556_s0 = inlined_call_operand.hbm [shape: f32[8,32], index: 0, kind: input, shape index: {}]   ;;  %s557_s1 = inlined_call_operand.hbm [shape: f32[16,32], index: 1, kind: input, shape index: {}]   ;;  %s558_s2 = inlined_call_operand.vmem [shape: f32[1,16], index: 2, kind: input, shape index: {}]   ;;  %s559_s3 = inlined_call_operand.hbm [shape: f32[8,16], index: 3, kind: input, shape index: {}]   ;;  %s560_s4 = inlined_call_operand.vmem [shape: f32[1,8], index: 4, kind: input, shape index: {}]   ;;  %s561_s5 = inlined_call_operand.vmem [shape: f32[1,8], index: 5, kind: input, shape index: {}]   ;;  %s562_s6 = inlined_call_operand.<no memory space> [shape: f32[1,1], index: 6, kind: input, shape index: {}]   ;;  %s563_s7 = inlined_call_operand.hbm [shape: f32[1,8], index: 7, kind: output, shape index: {}]  }
   0x1   :  { %v12_v0 = vstv %s562_s6 }
   0x2   :  { %13 = vst [vmem:[#allocation2] sm:$0x1] %v12_v0 }
   0x3   :  { %14 = vsyncpa [#allocation4], 0 }
   0x4   :  { %15 = vsyncpa [#allocation7], 0 }
   0x5   :  { %16 = vsyncpa [#allocation5], 0  ;;  %s480_s26 = smov [#allocation6]  }
   0x6   :  { %s32_s27 = sshll.u32 %s480_s26, 4  ;;  %s33_s27 = int_to_ptr.vmem [resolvable:$true] %s32_s27 }
   0x7   :  { %s402_s28 = scalar_lea.vmem %s33_s27, 256  ;;  %p407_p1 = scmp.lt.s32.totalorder %s33_s27, %s33_s27 }
   0x8   :  { %p403_p0 = scmp.ne.s32.totalorder %s33_s27, %s402_s28  ;;  %p408_p2 = scmp.lt.s32.totalorder %s402_s28, %s402_s28 }
   0xa   :  { %p409_p3 = por %p408_p2, %p407_p1 }
   0xc   :  { %p410_p4 = pnand %p409_p3, %p403_p0 }
   0xe   :  { %413 = shalt.err (!%p410_p4)
}
   0xf   :  { %s481_s29 = smov 128   ;;  %s482_s30 = smov 8  }
  0x10   :  { %38 = dma.hbm_to_vmem [thread:$0]  %s557_s1, 256, %s33_s27, [#allocation7], %s481_s29, %s481_s29, %s482_s30  }
  0x11   :  { %s483_s6 = smov [#allocation3]   ;;  %s484_s11 = smov [#allocation8]  }
  0x12   :  { %s23_s10 = sshll.u32 %s483_s6, 4  ;;  %s47_s12 = sshll.u32 %s484_s11, 4  ;;  %s24_s10 = int_to_ptr.vmem [resolvable:$true] %s23_s10  ;;  %s48_s12 = int_to_ptr.vmem [resolvable:$true] %s47_s12 }
  0x13   :  { %s422_s13 = scalar_lea.vmem %s24_s10, 128  ;;  %p427_p6 = scmp.lt.s32.totalorder %s24_s10, %s24_s10 }
  0x14   :  { %p423_p5 = scmp.ne.s32.totalorder %s24_s10, %s422_s13  ;;  %p428_p7 = scmp.lt.s32.totalorder %s422_s13, %s422_s13 }
  0x16   :  { %p429_p8 = por %p428_p7, %p427_p6 }
  0x18   :  { %p430_p9 = pnand %p429_p8, %p423_p5 }
  0x1a   :  { %433 = shalt.err (!%p430_p9)
}
  0x1b   :  { %26 = dma.hbm_to_vmem [thread:$0]  %s556_s0, 128, %s24_s10, [#allocation4]  }
  0x1c   :  { %s442_s16 = scalar_lea.vmem %s48_s12, 128  ;;  %p447_p11 = scmp.lt.s32.totalorder %s48_s12, %s48_s12 }
  0x1d   :  { %p443_p10 = scmp.ne.s32.totalorder %s48_s12, %s442_s16  ;;  %p448_p12 = scmp.lt.s32.totalorder %s442_s16, %s442_s16 }
  0x1f   :  { %p449_p13 = por %p448_p12, %p447_p11 }
  0x21   :  { %p450_p0 = pnand %p449_p13, %p443_p10 }
  0x23   :  { %453 = shalt.err (!%p450_p0)
}
  0x24   :  { %50 = dma.hbm_to_vmem [thread:$0]  %s559_s3, 128, %s48_s12, [#allocation7]  }
  0x25   :  { %474 = dma.done.wait [#allocation4], 128  }
  0x26   :  { %475 = vsyncadd [#allocation4], 4294967168 }
  0x27   :  { %476 = dma.done.wait [#allocation7], 384  }
  0x28   :  { %477 = vsyncadd [#allocation7], 4294966912  ;;  %v485_v1 = vmov 0.0   ;;  %vm486_vm0 = vmmov 0   ;;  %vm76_vm1 = vcmask 261120   ;;  %v68_v2 = vld [vmem:[#allocation6 + $0x8] sm:$0xff]  ;;  %v252_v21 = vlaneseq }
  0x29   :  { %367 = vmatprep.subr.mxu0 %v485_v1  ;;  %371 = vmatprep.mubr.msk.f32.mxu0 %vm486_vm0, %v485_v1  ;;  %v67_v3 = vld [vmem:[#allocation6] sm:$0xff]  ;;  %v66_v4 = vld [vmem:[#allocation3] sm:$0xff]  ;;  %v158_v5 = vld [vmem:[#allocation8] sm:$0xff]  ;;  %vm166_vm2 = vcmask 130048   ;;  %v487_v13 = vmov 0   ;;  %vm256_vm3 = vcmask 64512  }
  0x2a   :  { %374 = vmatprep.subr.mxu1 %v485_v1  ;;  %376 = vmatprep.mubr.msk.f32.mxu1 %vm486_vm0, %v485_v1  ;;  %v351_v6 = vld [vmem:[%s558_s2] ss:$0 sm:$0xff]  ;;  %v253_v22 = vshrl.u32 %v252_v21, 7  ;;  %s488_s21 = smov [#allocation9]   ;;  %vm333_vm4 = vcmask 57344  }
  0x2b   :  { %368 = vmatpush3.xpose.msk.msra.mxu0 %vm76_vm1, %v68_v2  ;;  %375 = vmatpush3.xpose.msk.msra.mxu1 %vm166_vm2, %v158_v5  ;;  %v246_v12 = vld [vmem:[#allocation2] sm:$0x1]  ;;  %s341_s22 = sshll.u32 %s488_s21, 4  ;;  %s342_s22 = int_to_ptr.vmem [resolvable:$true] %s341_s22 }
  0x2c   :  { %369 = vmatprep.subr.mxu0 %v485_v1  ;;  %379 = vmatprep.subr.mxu1 %v485_v1  ;;  %v355_v14 = vld [vmem:[%s560_s4] ss:$0 sm:$0xff]  ;;  %v254_v23 = vsub.s32 0, %v253_v22  ;;  %s454_s4 = scalar_lea.vmem %s342_s22, 16  ;;  %s458_s23 = scalar_lea.vmem %s342_s22, 32 }
  0x2d   :  { %393 = vset.pattern.permute.xlu0 %v487_v13  ;;  %v245_v20 = vld [vmem:[%s561_s5] sm:$0x1]  ;;  %p455_p1 = scmp.ne.s32.totalorder %s342_s22, %s454_s4  ;;  %p459_p2 = scmp.lt.s32.totalorder %s342_s22, %s342_s22 }
  0x2e   :  { %249 = vperm.xlu0 %393, %v246_v12   ;;  %p460_p3 = scmp.lt.s32.totalorder %s458_s23, %s454_s4 }
  0x2f   :  { %370 = vmatpush3.xpose.msk.msra.mxu0 %vm76_vm1, %v67_v3 }
  0x30   :  { %p461_p4 = por %p460_p3, %p459_p2 }
  0x32   :  { %372 = vmatmul.mubr.msk.f32.vlgmr.msra.gmra.mxu0 %vm76_vm1, %v66_v4  ;;  %p462_p5 = pnand %p461_p4, %p455_p1 }
  0xa9   :  { %v250_v24 = vpop.permute.xlu0 %249 }
  0xaa   :  { %v255_v25 = vrot.slane %v250_v24, %v254_v23 }
  0xf2   :  { %v152_v7 = vpop.f32.mrf.mxu0 }
  0xf3   :  { %v153_v8 = vadd.f32 %v351_v6, %v152_v7 }
  0xf4   :  { %v373_v9 = vpop.f32.mrf.mxu0 }
  0xf5   :  { %v156_v10 = vmul.f32 0.1, %v153_v8 }
  0xf7   :  { %v157_v11 = vmax.f32 %v153_v8, %v156_v10 }
  0xf9   :  { %377 = vmatmul.mubr.msk.f32.vlgmr.msra.gmra.mxu1 %vm166_vm2, %v157_v11 }
  0xfa   :  { %381 = vmatprep.mubr.msk.f32.mxu1 %vm486_vm0, %v485_v1 }
 0x1b9   :  { %v239_v15 = vpop.f32.mrf.mxu1 }
 0x1ba   :  { %v240_v16 = vadd.f32 %v355_v14, %v239_v15 }
 0x1bb   :  { %v378_v17 = vpop.f32.mrf.mxu1 }
 0x1bc   :  { %v243_v18 = vmul.f32 0.1, %v240_v16 }
 0x1be   :  { %v244_v19 = vmax.f32 %v240_v16, %v243_v18 }
 0x1c0   :  { %380 = vmatpush3.xpose.msk.msra.mxu1 %vm256_vm3, %v244_v19 }
 0x1c3   :  { %382 = vmatmul.mubr.msk.f32.vlgmr.msra.gmra.mxu1 %vm256_vm3, %v245_v20 }
 0x283   :  { %v329_v26 = vpop.f32.mrf.mxu1 }
 0x284   :  { %v330_v27 = vadd.f32 %v329_v26, %v255_v25 }
 0x285   :  { %v383_v28 = vpop.f32.mrf.mxu1 }
 0x286   :  { %334 = vst.msk [vmem:[#allocation9] sm:$0x1] %vm333_vm4, %v330_v27 }
 0x287   :  { %465 = shalt.err (!%p462_p5)
}
 0x288   :  { %344 = dma.vmem_to_hbm [thread:$0]  %s342_s22, 16, %s563_s7, [#allocation5]  }
 0x289   :  { %478 = dma.done.wait [#allocation5], 16  }
 0x28a   :  { %479 = vsyncadd [#allocation5], 4294967280 }
 0x28b   :  { %348 = vsyncpa [#allocation4], 1 }
 0x28c   :  { %349 = vsyncpa [#allocation7], 1 }
 0x28d   :  { %350 = vsyncpa [#allocation5], 1 }

</bundles_post_ra>
